<compile_context>
chip_gen: v6e
topology: v6e:2x2x1
jax: 0.10.0
libtpu: 0.0.40
codegen_flags: <defaults>
</compile_context>

<pallas_src>
import functools

import jax
import jax.numpy as jnp
from jax.experimental import pallas as pl
from jax.experimental.pallas import tpu as pltpu


# ----------------------------- helpers ---------------------------------------
def _round_up(x, m):
    return (x + m - 1) // m * m


def _vmem_capacity_bytes():
    try:
        return int(pltpu.get_tpu_info().vmem_capacity_bytes)
    except Exception:
        return 64 * 1024 * 1024  # conservative (v7x) fallback


def _vmem_limit_bytes():
    return int(min(0.75 * _vmem_capacity_bytes(), 100 * 1024 * 1024))


def _pick_tiles(n_pad, f_pad):
    """Pick (tm, tk) for the K-tiled aggregation.

    Accounts for Pallas double-buffering every input, the f32 accumulator
    scratch and f32 epilogue temporaries, so per-tile VMEM is independent of
    N.  Prefers >= 2 row tiles so megacore (v7x) keeps both cores busy.
    """
    budget = int(0.40 * _vmem_capacity_bytes())
    tk = 128
    for cand in (1024, 512, 256, 128):
        if n_pad % cand == 0:
            tk = cand
            break
    fitting = []
    for tm in (512, 256, 128, 64):
        if n_pad % tm:
            continue
        need = (2 * tm * tk               # int8 A tile, double buffered
                + 2 * tk * f_pad * 2      # bf16 XW tile, double buffered
                + 2 * tm * f_pad * 2      # bf16 out tile, double buffered
                + tm * f_pad * 4          # f32 accumulator scratch
                + 4 * tm * f_pad * 4      # f32 temps in the LN/ReLU epilogue
                + 2 * tm * 4              # d^-1/2 row block
                + 6 * f_pad * 4)          # bias / gamma / beta
        if need <= budget:
            fitting.append(tm)
    if not fitting:
        return 64, tk
    multi = [t for t in fitting if n_pad // t >= 2]   # >=2 row tiles if possible
    return (multi[0] if multi else fitting[0]), tk


# ----------------------------- Pallas kernels --------------------------------
def _layernorm_relu(h, gamma, beta, inv_f):
    # Padded feature lanes of h are exactly 0, so the unmasked sums are exact
    # for the true width; gamma/beta padding (0) zeroes padded output lanes.
    mean = jnp.sum(h, axis=-1, keepdims=True) * inv_f
    var = jnp.sum(h * h, axis=-1, keepdims=True) * inv_f - mean * mean
    var = jnp.maximum(var, 0.0)            # clamp tiny negatives before rsqrt
    hn = (h - mean) * jax.lax.rsqrt(var + 1e-5)
    return jnp.maximum(hn * gamma + beta, 0.0)


def _a_to_bf16(a_i8):
    # int8 {0,1} -> bf16 via f32 (safe lowering path); exact, VPU work hidden
    # under the MXU.
    return a_i8.astype(jnp.float32).astype(jnp.bfloat16)


def _xw_scaled_kernel(x_ref, w_ref, dinv_ref, o_ref):
    # (X @ W) scaled per row by deg^-1/2 ("column" scaling of the aggregation).
    xw = jnp.dot(x_ref[...], w_ref[...], preferred_element_type=jnp.float32)
    o_ref[...] = (xw * dinv_ref[...]).astype(o_ref.dtype)


def _agg_ln_relu_kernel(a_ref, xw_ref, dinv_ref, b_ref, g_ref, be_ref,
                        o_ref, acc_ref, *, inv_f):
    # K-tiled binary aggregation with f32 accumulator scratch.
    @pl.when(pl.program_id(1) == 0)
    def _():
        acc_ref[...] = jnp.zeros_like(acc_ref)

    acc_ref[...] += jnp.dot(_a_to_bf16(a_ref[...]), xw_ref[...],
                            preferred_element_type=jnp.float32)

    @pl.when(pl.program_id(1) == pl.num_programs(1) - 1)
    def _():
        h = acc_ref[...] * dinv_ref[...] + b_ref[...]
        # Dropout: eval mode -> identity.
        o_ref[...] = _layernorm_relu(h, g_ref[...], be_ref[...],
                                     inv_f).astype(o_ref.dtype)


def _fused_layer_kernel(a_ref, x_ref, w_ref, dinv_col_ref, dinv_row_ref,
                        b_ref, g_ref, be_ref, o_ref, *, inv_f):
    # Small-graph path: one kernel does the whole layer per row tile.
    xw = jnp.dot(x_ref[...], w_ref[...], preferred_element_type=jnp.float32)
    xw = (xw * dinv_col_ref[...]).astype(jnp.bfloat16)
    h = jnp.dot(_a_to_bf16(a_ref[...]), xw, preferred_element_type=jnp.float32)
    h = h * dinv_row_ref[...] + b_ref[...]
    o_ref[...] = _layernorm_relu(h, g_ref[...], be_ref[...],
                                 inv_f).astype(o_ref.dtype)


# ----------------------------- wrappers ---------------------------------------
def xw_scaled_matmul(x, w, d_inv, tm):
    """Row-tiled (X @ W) * deg^-1/2  (bf16 in/out, f32 MXU accumulation)."""
    n_pad, fin_pad = x.shape
    f_pad = w.shape[1]
    grid = (n_pad // tm,)
    cost = pl.CostEstimate(
        flops=2 * n_pad * fin_pad * f_pad,
        transcendentals=0,
        bytes_accessed=int(x.size * 2 + w.size * 2 + d_inv.size * 4
                           + n_pad * f_pad * 2),
    )
    return pl.pallas_call(
        _xw_scaled_kernel,
        out_shape=jax.ShapeDtypeStruct((n_pad, f_pad), jnp.bfloat16),
        grid=grid,
        in_specs=[
            pl.BlockSpec((tm, fin_pad), lambda i: (i, 0)),
            pl.BlockSpec((fin_pad, f_pad), lambda i: (0, 0)),
            pl.BlockSpec((tm, 1), lambda i: (i, 0)),
        ],
        out_specs=pl.BlockSpec((tm, f_pad), lambda i: (i, 0)),
        compiler_params=pltpu.CompilerParams(
            dimension_semantics=("parallel",),
            vmem_limit_bytes=_vmem_limit_bytes(),
        ),
        cost_estimate=cost,
    )(x, w, d_inv)


def gcn_agg_ln_relu(a_i8, xw, d_inv, b, gamma, beta, f_valid, tm, tk):
    """K-tiled binary aggregation + deg scaling + bias + LayerNorm + ReLU."""
    n_pad = a_i8.shape[0]
    f_pad = xw.shape[1]
    n_rows = n_pad // tm
    grid = (n_rows, n_pad // tk)
    cost = pl.CostEstimate(
        flops=2 * n_pad * n_pad * f_pad + 10 * n_pad * f_pad,
        transcendentals=n_pad,  # rsqrt per row
        bytes_accessed=int(a_i8.size                 # int8 A, streamed once
                           + n_rows * xw.size * 2    # XW re-streamed per row tile
                           + n_pad * f_pad * 2       # output
                           + n_pad * 4 + 3 * f_pad * 4),
    )
    kernel = functools.partial(_agg_ln_relu_kernel, inv_f=1.0 / float(f_valid))
    return pl.pallas_call(
        kernel,
        out_shape=jax.ShapeDtypeStruct((n_pad, f_pad), jnp.bfloat16),
        grid=grid,
        in_specs=[
            pl.BlockSpec((tm, tk), lambda i, k: (i, k)),      # int8 A tile
            pl.BlockSpec((tk, f_pad), lambda i, k: (k, 0)),   # scaled XW tile
            pl.BlockSpec((tm, 1), lambda i, k: (i, 0)),       # deg^-1/2 rows
            pl.BlockSpec((1, f_pad), lambda i, k: (0, 0)),    # bias
            pl.BlockSpec((1, f_pad), lambda i, k: (0, 0)),    # gamma
            pl.BlockSpec((1, f_pad), lambda i, k: (0, 0)),    # beta
        ],
        out_specs=pl.BlockSpec((tm, f_pad), lambda i, k: (i, 0)),
        scratch_shapes=[pltpu.VMEM((tm, f_pad), jnp.float32)],
        compiler_params=pltpu.CompilerParams(
            dimension_semantics=("parallel", "arbitrary"),
            vmem_limit_bytes=_vmem_limit_bytes(),
        ),
        cost_estimate=cost,
    )(a_i8, xw, d_inv, b, gamma, beta)


def gcn_fused_layer(a_i8, x, w, d_inv, b, gamma, beta, f_valid, tm):
    """Small-graph path: fully fused XW + aggregation + bias + LN + ReLU."""
    n_pad = a_i8.shape[0]
    fin_pad = x.shape[1]
    f_pad = w.shape[1]
    n_rows = n_pad // tm
    grid = (n_rows,)
    cost = pl.CostEstimate(
        flops=(2 * n_pad * n_pad * f_pad
               + n_rows * 2 * n_pad * fin_pad * f_pad   # XW recompute per tile
               + 10 * n_pad * f_pad),
        transcendentals=n_pad,
        bytes_accessed=int(a_i8.size + x.size * 2 + w.size * 2
                           + n_pad * f_pad * 2 + n_pad * 4 + 3 * f_pad * 4),
    )
    kernel = functools.partial(_fused_layer_kernel, inv_f=1.0 / float(f_valid))
    return pl.pallas_call(
        kernel,
        out_shape=jax.ShapeDtypeStruct((n_pad, f_pad), jnp.bfloat16),
        grid=grid,
        in_specs=[
            pl.BlockSpec((tm, n_pad), lambda i: (i, 0)),        # int8 A rows
            pl.BlockSpec((n_pad, fin_pad), lambda i: (0, 0)),   # X (resident)
            pl.BlockSpec((fin_pad, f_pad), lambda i: (0, 0)),   # W (resident)
            pl.BlockSpec((n_pad, 1), lambda i: (0, 0)),         # deg^-1/2 (all)
            pl.BlockSpec((tm, 1), lambda i: (i, 0)),            # deg^-1/2 rows
            pl.BlockSpec((1, f_pad), lambda i: (0, 0)),         # bias
            pl.BlockSpec((1, f_pad), lambda i: (0, 0)),         # gamma
            pl.BlockSpec((1, f_pad), lambda i: (0, 0)),         # beta
        ],
        out_specs=pl.BlockSpec((tm, f_pad), lambda i: (i, 0)),
        compiler_params=pltpu.CompilerParams(
            dimension_semantics=("parallel",),
            vmem_limit_bytes=_vmem_limit_bytes(),
        ),
        cost_estimate=cost,
    )(a_i8, x, w, d_inv, d_inv, b, gamma, beta)


# ----------------------------- JAX glue ---------------------------------------
def build_binary_adj(edge_index, n_nodes, n_pad):
    """Binary (A + I) as int8, padded to (n_pad, n_pad), plus deg^-1/2 (f32).

    Normalization is factored out of the streamed matrix so it holds exact
    0/1 values:  D^-1/2 (A+I) D^-1/2 XW == d_row * ((A+I) @ (d_col * XW)).
    No dense f32 temporary is materialized.
    """
    src = edge_index[0]
    dst = edge_index[1]
    a = jnp.zeros((n_pad, n_pad), jnp.int8)
    a = a.at[dst, src].set(1)                   # message flows src -> dst
    diag = jnp.arange(n_nodes)
    a = a.at[diag, diag].set(1)                 # self loops on real nodes only
    deg = jnp.sum(a, axis=1, dtype=jnp.float32)
    d_inv_sqrt = jnp.where(deg > 0.0,
                           jax.lax.rsqrt(jnp.maximum(deg, 1e-12)), 0.0)
    return a, d_inv_sqrt.reshape(n_pad, 1).astype(jnp.float32)


def init_gnn_params(key, n_in, n_hid, n_layers):
    """Glorot-uniform W, zero b, LayerNorm gamma=1 / beta=0 (f32 masters)."""
    params = []
    f_in = n_in
    for _ in range(n_layers):
        key, wk = jax.random.split(key)
        limit = jnp.sqrt(6.0 / (f_in + n_hid))
        w = jax.random.uniform(wk, (f_in, n_hid), jnp.float32, -limit, limit)
        b = jnp.zeros((n_hid,), jnp.float32)
        gamma = jnp.ones((n_hid,), jnp.float32)
        beta = jnp.zeros((n_hid,), jnp.float32)
        params.append((w, b, gamma, beta))
        f_in = n_hid
    return params


def gnn_forward(params, x, edge_index, node_type=None, edge_type=None):
    """Forward pass of GNN (conv_name != 'hgt' -> no init_fc).

    node_type / edge_type are unused by the 'gcn' conv variant.
    """
    n, f_in = x.shape
    n_hid = params[0][0].shape[1]
    f_pad = _round_up(n_hid, 128)

    n_pad = _round_up(n, 128)
    tm, tk = _pick_tiles(n_pad, f_pad)

    a_i8, d_inv = build_binary_adj(edge_index, n, n_pad)

    # Zero-pad input features to 128 lanes; activations travel as bf16.
    fin_pad = _round_up(f_in, 128)
    act = jnp.zeros((n_pad, fin_pad), jnp.bfloat16).at[:n, :f_in].set(
        x.astype(jnp.bfloat16))

    # Small graphs (<= 2 row tiles and everything fits in VMEM): fully fused
    # per-layer kernel (no XW HBM round trip, one launch per layer).
    # Large graphs: hoisted scaled XW + K-tiled aggregation (per-tile VMEM
    # independent of N).
    feat_max = max(fin_pad, f_pad)
    use_fused = (n_pad // tm <= 2) and (
        (n_pad * feat_max * 2 + feat_max * f_pad * 2) * 2
        < 0.25 * _vmem_capacity_bytes())

    for (w, b, gamma, beta) in params:
        fi = w.shape[0]
        fi_pad = _round_up(fi, 128)
        w_p = jnp.zeros((fi_pad, f_pad), jnp.bfloat16).at[:fi, :n_hid].set(
            w.astype(jnp.bfloat16))
        b_p = jnp.zeros((1, f_pad), jnp.float32).at[0, :n_hid].set(b)
        g_p = jnp.zeros((1, f_pad), jnp.float32).at[0, :n_hid].set(gamma)
        be_p = jnp.zeros((1, f_pad), jnp.float32).at[0, :n_hid].set(beta)

        if use_fused:
            act = gcn_fused_layer(a_i8, act, w_p, d_inv,
                                  b_p, g_p, be_p, n_hid, tm)
        else:
            xw = xw_scaled_matmul(act, w_p, d_inv, tm)
            act = gcn_agg_ln_relu(a_i8, xw, d_inv,
                                  b_p, g_p, be_p, n_hid, tm, tk)

    return act[:n, :n_hid].astype(jnp.float32)


# ----------------------------- Demo -------------------------------------------
if __name__ == "__main__":
    key = jax.random.PRNGKey(0)

    N = 64          # number of nodes
    n_in = 32
    n_hid = 32
    n_layers = 2
    E = 128         # directed edges (symmetrized below)

    k_x, k_e, k_p = jax.random.split(key, 3)
    x = jax.random.normal(k_x, (N, n_in), jnp.float32)
    src = jax.random.randint(k_e, (E,), 0, N)
    dst = jax.random.randint(jax.random.fold_in(k_e, 1), (E,), 0, N)
    # symmetrize so the symmetric normalization is well-defined
    edge_index = jnp.stack(
        [jnp.concatenate([src, dst]), jnp.concatenate([dst, src])], axis=0
    )
    node_type = jnp.zeros((N,), jnp.int32)   # unused by 'gcn' conv
    edge_type = None                          # unused by 'gcn' conv

    params = init_gnn_params(k_p, n_in, n_hid, n_layers)

    fwd = jax.jit(gnn_forward)
    out = fwd(params, x, edge_index, node_type, edge_type)
    out = jax.block_until_ready(out)

    assert out.shape == (N, n_hid)
    assert bool(jnp.all(jnp.isfinite(out)))
    assert bool(jnp.all(out >= 0.0))  # ReLU output
    print("KERNEL_OK")
</pallas_src>

<mosaic_0001>
module attributes {stable_mosaic.version = 11 : i64} {
  func.func @_fused_layer_kernel(%arg0: i32, %arg1: memref<64x128xi8, #tpu.memory_space<vmem>>, %arg2: memref<128x128xbf16, #tpu.memory_space<vmem>>, %arg3: memref<128x128xbf16, #tpu.memory_space<vmem>>, %arg4: memref<128x1xf32, #tpu.memory_space<vmem>>, %arg5: memref<64x1xf32, #tpu.memory_space<vmem>>, %arg6: memref<1x128xf32, #tpu.memory_space<vmem>>, %arg7: memref<1x128xf32, #tpu.memory_space<vmem>>, %arg8: memref<1x128xf32, #tpu.memory_space<vmem>>, %arg9: memref<64x128xbf16, #tpu.memory_space<vmem>>) attributes {dimension_semantics = [#tpu.dimension_semantics<parallel>], iteration_bounds = array<i64: 2>, scalar_prefetch = 0 : i64, scratch_operands = 0 : i64, tpu.core_type = #tpu.core_type<tc>, window_params = [{transform_indices = @transform_0, window_bounds = array<i64: 64, 128>}, {pipeline_mode = #tpu.pipeline_mode<synchronous>, transform_indices = @transform_1, window_bounds = array<i64: 128, 128>}, {pipeline_mode = #tpu.pipeline_mode<synchronous>, transform_indices = @transform_2, window_bounds = array<i64: 128, 128>}, {pipeline_mode = #tpu.pipeline_mode<synchronous>, transform_indices = @transform_3, window_bounds = array<i64: 128, 1>}, {transform_indices = @transform_4, window_bounds = array<i64: 64, 1>}, {pipeline_mode = #tpu.pipeline_mode<synchronous>, transform_indices = @transform_5, window_bounds = array<i64: 1, 128>}, {pipeline_mode = #tpu.pipeline_mode<synchronous>, transform_indices = @transform_6, window_bounds = array<i64: 1, 128>}, {pipeline_mode = #tpu.pipeline_mode<synchronous>, transform_indices = @transform_7, window_bounds = array<i64: 1, 128>}, {transform_indices = @transform_8, window_bounds = array<i64: 64, 128>}]} {
    %c0 = arith.constant 0 : index
    %c0_0 = arith.constant 0 : index
    %0 = vector.load %arg2[%c0, %c0_0] : memref<128x128xbf16, #tpu.memory_space<vmem>>, vector<128x128xbf16>
    %c0_1 = arith.constant 0 : index
    %c0_2 = arith.constant 0 : index
    %1 = vector.load %arg3[%c0_1, %c0_2] : memref<128x128xbf16, #tpu.memory_space<vmem>>, vector<128x128xbf16>
    %cst = arith.constant dense<0.000000e+00> : vector<128x128xf32>
    %2 = tpu.matmul %0, %1, %cst {dimension_numbers = #tpu.dot_dimension_numbers<[1], [0], [0], [1], [0, 0, 1, 1], [], []>} : vector<128x128xbf16>, vector<128x128xbf16>, vector<128x128xf32> -> vector<128x128xf32>
    %c0_3 = arith.constant 0 : index
    %c0_4 = arith.constant 0 : index
    %3 = vector.load %arg4[%c0_3, %c0_4] : memref<128x1xf32, #tpu.memory_space<vmem>>, vector<128x1xf32>
    %4 = vector.broadcast %3 : vector<128x1xf32> to vector<128x128xf32>
    %5 = arith.mulf %2, %4 : vector<128x128xf32>
    %6 = arith.truncf %5 : vector<128x128xf32> to vector<128x128xbf16>
    %c0_5 = arith.constant 0 : index
    %c0_6 = arith.constant 0 : index
    %7 = vector.load %arg1[%c0_5, %c0_6] : memref<64x128xi8, #tpu.memory_space<vmem>>, vector<64x128xi8>
    %8 = arith.sitofp %7 : vector<64x128xi8> to vector<64x128xf32>
    %9 = arith.truncf %8 : vector<64x128xf32> to vector<64x128xbf16>
    %cst_7 = arith.constant dense<0.000000e+00> : vector<64x128xf32>
    %10 = tpu.matmul %9, %6, %cst_7 {dimension_numbers = #tpu.dot_dimension_numbers<[1], [0], [0], [1], [0, 0, 1, 1], [], []>} : vector<64x128xbf16>, vector<128x128xbf16>, vector<64x128xf32> -> vector<64x128xf32>
    %c0_8 = arith.constant 0 : index
    %c0_9 = arith.constant 0 : index
    %11 = vector.load %arg5[%c0_8, %c0_9] : memref<64x1xf32, #tpu.memory_space<vmem>>, vector<64x1xf32>
    %12 = vector.broadcast %11 : vector<64x1xf32> to vector<64x128xf32>
    %13 = arith.mulf %10, %12 : vector<64x128xf32>
    %c0_10 = arith.constant 0 : index
    %c0_11 = arith.constant 0 : index
    %14 = vector.load %arg6[%c0_10, %c0_11] : memref<1x128xf32, #tpu.memory_space<vmem>>, vector<1x128xf32>
    %15 = vector.broadcast %14 : vector<1x128xf32> to vector<64x128xf32>
    %16 = arith.addf %13, %15 : vector<64x128xf32>
    %c0_12 = arith.constant 0 : index
    %c0_13 = arith.constant 0 : index
    %17 = vector.load %arg7[%c0_12, %c0_13] : memref<1x128xf32, #tpu.memory_space<vmem>>, vector<1x128xf32>
    %c0_14 = arith.constant 0 : index
    %c0_15 = arith.constant 0 : index
    %18 = vector.load %arg8[%c0_14, %c0_15] : memref<1x128xf32, #tpu.memory_space<vmem>>, vector<1x128xf32>
    %cst_16 = arith.constant dense<0.000000e+00> : vector<64xf32>
    %19 = vector.multi_reduction <add>, %16, %cst_16 [1] : vector<64x128xf32> to vector<64xf32>
    %20 = vector.shape_cast %19 : vector<64xf32> to vector<64x1xf32>
    %cst_17 = arith.constant 3.125000e-02 : f32
    %21 = vector.broadcast %cst_17 : f32 to vector<64x1xf32>
    %22 = arith.mulf %20, %21 : vector<64x1xf32>
    %23 = arith.mulf %16, %16 : vector<64x128xf32>
    %cst_18 = arith.constant dense<0.000000e+00> : vector<64xf32>
    %24 = vector.multi_reduction <add>, %23, %cst_18 [1] : vector<64x128xf32> to vector<64xf32>
    %25 = vector.shape_cast %24 : vector<64xf32> to vector<64x1xf32>
    %cst_19 = arith.constant 3.125000e-02 : f32
    %26 = vector.broadcast %cst_19 : f32 to vector<64x1xf32>
    %27 = arith.mulf %25, %26 : vector<64x1xf32>
    %28 = arith.mulf %22, %22 : vector<64x1xf32>
    %29 = arith.subf %27, %28 : vector<64x1xf32>
    %cst_20 = arith.constant 0.000000e+00 : f32
    %30 = vector.broadcast %cst_20 : f32 to vector<64x1xf32>
    %31 = arith.maximumf %29, %30 : vector<64x1xf32>
    %32 = vector.broadcast %22 : vector<64x1xf32> to vector<64x128xf32>
    %33 = arith.subf %16, %32 : vector<64x128xf32>
    %cst_21 = arith.constant 9.99999974E-6 : f32
    %34 = vector.broadcast %cst_21 : f32 to vector<64x1xf32>
    %35 = arith.addf %31, %34 : vector<64x1xf32>
    %36 = math.rsqrt %35 : vector<64x1xf32>
    %37 = vector.broadcast %36 : vector<64x1xf32> to vector<64x128xf32>
    %38 = arith.mulf %33, %37 : vector<64x128xf32>
    %39 = vector.broadcast %17 : vector<1x128xf32> to vector<64x128xf32>
    %40 = arith.mulf %38, %39 : vector<64x128xf32>
    %41 = vector.broadcast %18 : vector<1x128xf32> to vector<64x128xf32>
    %42 = arith.addf %40, %41 : vector<64x128xf32>
    %cst_22 = arith.constant 0.000000e+00 : f32
    %43 = vector.broadcast %cst_22 : f32 to vector<64x128xf32>
    %44 = arith.maximumf %42, %43 : vector<64x128xf32>
    %45 = arith.truncf %44 : vector<64x128xf32> to vector<64x128xbf16>
    %c0_23 = arith.constant 0 : index
    %c0_24 = arith.constant 0 : index
    %46 = vector.load %arg9[%c0_23, %c0_24] : memref<64x128xbf16, #tpu.memory_space<vmem>>, vector<64x128xbf16>
    tpu.vector_store %arg9[%c0_23, %c0_24], %45 {strides = array<i32>} : memref<64x128xbf16, #tpu.memory_space<vmem>>, vector<64x128xbf16>,
    return
  }
  func.func @transform_0(%arg0: i32) -> (i32, i32) {
    %c0_i32 = arith.constant 0 : i32
    %c0_i32_0 = arith.constant 0 : i32
    return %arg0, %c0_i32 : i32, i32
  }
  func.func @transform_1(%arg0: i32) -> (i32, i32) {
    %c0_i32 = arith.constant 0 : i32
    %c0_i32_0 = arith.constant 0 : i32
    %c0_i32_1 = arith.constant 0 : i32
    return %c0_i32, %c0_i32_0 : i32, i32
  }
  func.func @transform_2(%arg0: i32) -> (i32, i32) {
    %c0_i32 = arith.constant 0 : i32
    %c0_i32_0 = arith.constant 0 : i32
    %c0_i32_1 = arith.constant 0 : i32
    return %c0_i32, %c0_i32_0 : i32, i32
  }
  func.func @transform_3(%arg0: i32) -> (i32, i32) {
    %c0_i32 = arith.constant 0 : i32
    %c0_i32_0 = arith.constant 0 : i32
    %c0_i32_1 = arith.constant 0 : i32
    return %c0_i32, %c0_i32_0 : i32, i32
  }
  func.func @transform_4(%arg0: i32) -> (i32, i32) {
    %c0_i32 = arith.constant 0 : i32
    %c0_i32_0 = arith.constant 0 : i32
    return %arg0, %c0_i32 : i32, i32
  }
  func.func @transform_5(%arg0: i32) -> (i32, i32) {
    %c0_i32 = arith.constant 0 : i32
    %c0_i32_0 = arith.constant 0 : i32
    %c0_i32_1 = arith.constant 0 : i32
    return %c0_i32, %c0_i32_0 : i32, i32
  }
  func.func @transform_6(%arg0: i32) -> (i32, i32) {
    %c0_i32 = arith.constant 0 : i32
    %c0_i32_0 = arith.constant 0 : i32
    %c0_i32_1 = arith.constant 0 : i32
    return %c0_i32, %c0_i32_0 : i32, i32
  }
  func.func @transform_7(%arg0: i32) -> (i32, i32) {
    %c0_i32 = arith.constant 0 : i32
    %c0_i32_0 = arith.constant 0 : i32
    %c0_i32_1 = arith.constant 0 : i32
    return %c0_i32, %c0_i32_0 : i32, i32
  }
  func.func @transform_8(%arg0: i32) -> (i32, i32) {
    %c0_i32 = arith.constant 0 : i32
    %c0_i32_0 = arith.constant 0 : i32
    return %arg0, %c0_i32 : i32, i32
  }
}

</mosaic_0001>

<bundles_post_ra>
// kernel: gnn_forward.2
= control target key start
LH: loop header
LB: loop body
LE: loop exit
PB: predicated region body
PF: predicated region fallthrough
CT: control target
= control target key end

     0   :  { %s1367_s27 = smov 0   ;;  %s1606_s0 = inlined_call_operand.vmem [shape: s8[128,128], index: 0, kind: input, shape index: {}]   ;;  %s1607_s1 = inlined_call_operand.vmem [shape: bf16[128,128], index: 1, kind: input, shape index: {}]   ;;  %s1608_s2 = inlined_call_operand.vmem [shape: bf16[128,128], index: 2, kind: input, shape index: {}]   ;;  %s1609_s3 = inlined_call_operand.vmem [shape: f32[128,1], index: 3, kind: input, shape index: {}, may-alias: {3,4}]   ;;  %s1610_s4 = inlined_call_operand.vmem [shape: f32[128,1], index: 4, kind: input, shape index: {}, may-alias: {3,4}]   ;;  %s1611_s5 = inlined_call_operand.vmem [shape: f32[1,128], index: 5, kind: input, shape index: {}]   ;;  %s1612_s6 = inlined_call_operand.vmem [shape: f32[1,128], index: 6, kind: input, shape index: {}]   ;;  %s1613_s7 = inlined_call_operand.vmem [shape: f32[1,128], index: 7, kind: input, shape index: {}]   ;;  %s1614_s8 = inlined_call_operand.vmem [shape: bf16[128,128], index: 8, kind: output, shape index: {}]  }
   0x1 LB: > { %s1111_s28 = sadd.s32 4294967295, %s1319_s27   ;;  %p1115_p0 = scmp.ge.s32.totalorder %s1319_s27, 1  ;;  %s1319_s27 = sphi %s1367_s27, %s18_s27  }
   0x2   : > { %p274_p1 = scmp.lt.s32.totalorder %s1319_s27, 3 }
   0x4   : > { %p275_p2 = pnand %p1115_p0, %p274_p1 }
   0x5   : > { %s1116_s21 = sshll.u32 (!%p275_p2), %s1111_s28, 3 }
   0x6   : > { %278 = sbr.rel (%p275_p2) target bundleno = 702 (0x2be), region = 52  ;;  %p314_p3 = scmp.lt.s32.totalorder (!%p275_p2), %s1116_s21, 15 }
   0xb   : > { %v1281_v0 = vld [vmem:[%s1608_s2 + $0x38] sm:$0xff]   ;;  %v1282_v1 = vld [vmem:[%s1608_s2 + $0x30] sm:$0xff]   ;;  %v1321_v2 = vmov 0   ;;  %v1283_v3 = vld [vmem:[%s1608_s2 + $0x28] sm:$0xff]   ;;  %s1616_s21 = smov (!%p314_p3, %s1116_s21), 15 }
   0xc   : > { %1279 = vset.pattern.permute.xlu0 %v1321_v2  ;;  %1280 = vset.pattern.permute.xlu1 %v1321_v2  ;;  %v1284_v4 = vld [vmem:[%s1608_s2 + $0x20] sm:$0xff]   ;;  %v1285_v6 = vld [vmem:[%s1608_s2 + $0x18] sm:$0xff]   ;;  %v1286_v7 = vld [vmem:[%s1608_s2 + $0x10] sm:$0xff]   ;;  %s1119_s22 = sshll.u32 %s1616_s21, 3  ;;  %s1117_s15 = sshll.u32 %s1616_s21, 1 }
   0xd   : > { %1214 = vmatprep.subr.bf16.mxu0 %v1281_v0  ;;  %v1289_v5 = vld [vmem:[%s1607_s1] sm:$0xff]   ;;  %v571_v8 = vld [vmem:[%s1609_s3 + $0x70] sm:$0xff]  ;;  %v572_v10 = vld [vmem:[%s1609_s3 + $0x78] sm:$0xff]  ;;  %s323_s9 = scalar_lea.vmem %s1610_s4, %s1119_s22  ;;  %s1483_s18 = scalar_lea.vmem %s1606_s0, %s1117_s15 }
   0xe   : > { %1215 = vmatpush3.bf16.msra.mxu0 %v1281_v0  ;;  %1230 = vmatprep.mubr.bf16.mxu0 %v1289_v5  ;;  %v569_v9 = vld [vmem:[%s1609_s3 + $0x60] sm:$0xff]  ;;  %v570_v11 = vld [vmem:[%s1609_s3 + $0x68] sm:$0xff]  ;;  %v567_v13 = vld [vmem:[%s1609_s3 + $0x50] sm:$0xff]  ;;  %s1121_s26 = sshll.u32 %s1616_s21, 2 }
   0xf   : > { %1216 = vmatprep.subr.bf16.mxu0 %v1282_v1  ;;  %645 = vperm.xlu0 %1279, %v571_v8   ;;  %v1287_v12 = vld [vmem:[%s1608_s2 + $0x8] sm:$0xff]   ;;  %v568_v14 = vld [vmem:[%s1609_s3 + $0x58] sm:$0xff]  ;;  %v1288_v15 = vld [vmem:[%s1608_s2] sm:$0xff]  }
  0x10   : > { %635 = vperm.xlu1 %1280, %v569_v9   ;;  %v565_v16 = vld [vmem:[%s1609_s3 + $0x40] sm:$0xff]  ;;  %v566_v17 = vld [vmem:[%s1609_s3 + $0x48] sm:$0xff]  ;;  %v563_v19 = vld [vmem:[%s1609_s3 + $0x30] sm:$0xff] }
  0x11   : > { %v1290_v18 = vld [vmem:[%s1607_s1 + $0x8] sm:$0xff]   ;;  %v564_v20 = vld [vmem:[%s1609_s3 + $0x38] sm:$0xff]  ;;  %v1291_v21 = vld [vmem:[%s1607_s1 + $0x10] sm:$0xff]  }
  0x12   : > { %1217 = vmatpush3.bf16.msra.mxu0 %v1282_v1  ;;  %v561_v22 = vld [vmem:[%s1609_s3 + $0x20] sm:$0xff]  ;;  %v562_v23 = vld [vmem:[%s1609_s3 + $0x28] sm:$0xff]  ;;  %v1292_v24 = vld [vmem:[%s1607_s1 + $0x18] sm:$0xff]  }
  0x13   : > { %1218 = vmatprep.subr.bf16.mxu0 %v1283_v3  ;;  %650 = vperm.xlu0 %1279, %v572_v10   ;;  %v559_v25 = vld [vmem:[%s1609_s3 + $0x10] sm:$0xff]  ;;  %v560_v26 = vld [vmem:[%s1609_s3 + $0x18] sm:$0xff]  ;;  %v1293_v27 = vld [vmem:[%s1607_s1 + $0x20] sm:$0xff]  }
  0x14   : > { %640 = vperm.xlu1 %1280, %v570_v11   ;;  %v557_v28 = vld [vmem:[%s1609_s3] sm:$0xff]  ;;  %v558_v29 = vld [vmem:[%s1609_s3 + $0x8] sm:$0xff]  ;;  %v1295_v33 = vld [vmem:[%s1607_s1 + $0x30] sm:$0xff]  }
  0x15   : > { %v1294_v30 = vld [vmem:[%s1607_s1 + $0x28] sm:$0xff]   ;;  %v782_v31 = vld [vmem:[%s323_s9] sm:$0xff]  ;;  %v784_v34 = vld [vmem:[%s323_s9 + $0x10] sm:$0xff] }
  0x16   : > { %1219 = vmatpush3.bf16.msra.mxu0 %v1283_v3  ;;  %v783_v32 = vld [vmem:[%s323_s9 + $0x8] sm:$0xff]  ;;  %v785_v35 = vld [vmem:[%s323_s9 + $0x18] sm:$0xff]  ;;  %v786_v37 = vld [vmem:[%s323_s9 + $0x20] sm:$0xff] }
  0x17   : > { %1220 = vmatprep.subr.bf16.mxu0 %v1284_v4  ;;  %625 = vperm.xlu0 %1279, %v567_v13   ;;  %v1296_v36 = vld [vmem:[%s1607_s1 + $0x38] sm:$0xff]   ;;  %v787_v38 = vld [vmem:[%s323_s9 + $0x28] sm:$0xff]  ;;  %v788_v39 = vld [vmem:[%s323_s9 + $0x30] sm:$0xff] }
  0x18   : > { %630 = vperm.xlu1 %1280, %v568_v14   ;;  %v789_v40 = vld [vmem:[%s323_s9 + $0x38] sm:$0xff]  ;;  %v677_v41 = vld [vmem:[%s1483_s18] sm:$0x3]  ;;  %v678_v42 = vld [vmem:[%s1483_s18 + $0x2] sm:$0x3]  ;;  %s1585_s9 = scalar_lea.vmem %s1614_s8, %s1121_s26 }
  0x19   : > { %v685_v43 = vunpack.c.l.s8.bf16 %v677_v41  ;;  %v686_v44 = vunpack.c.l.s8.bf16 %v678_v42 }
  0x1a   : > { %1221 = vmatpush3.bf16.msra.mxu0 %v1284_v4 }
  0x1b   : > { %1222 = vmatprep.subr.bf16.mxu0 %v1285_v6  ;;  %615 = vperm.xlu0 %1279, %v565_v16   ;;  %v1138_v45 = vcombine.low %v685_v43, %v686_v44 }
  0x1c   : > { %620 = vperm.xlu1 %1280, %v566_v17  }
  0x1d   : > { %1262 = vmatprep.mubr.bf16.mxu1 %v1138_v45 }
  0x1e   : > { %1223 = vmatpush3.bf16.msra.mxu0 %v1285_v6 }
  0x1f   : > { %1224 = vmatprep.subr.bf16.mxu0 %v1286_v7  ;;  %605 = vperm.xlu0 %1279, %v563_v19  }
  0x20   : > { %610 = vperm.xlu1 %1280, %v564_v20  }
  0x22   : > { %1225 = vmatpush3.bf16.msra.mxu0 %v1286_v7 }
  0x23   : > { %1226 = vmatprep.subr.bf16.mxu0 %v1287_v12  ;;  %595 = vperm.xlu0 %1279, %v561_v22  }
  0x24   : > { %600 = vperm.xlu1 %1280, %v562_v23  }
  0x26   : > { %1227 = vmatpush3.bf16.msra.mxu0 %v1287_v12 }
  0x27   : > { %1228 = vmatprep.subr.bf16.mxu0 %v1288_v15  ;;  %585 = vperm.xlu0 %1279, %v559_v25  }
  0x28   : > { %590 = vperm.xlu1 %1280, %v560_v26  }
  0x2a   : > { %1229 = vmatpush3.bf16.msra.mxu0 %v1288_v15 }
  0x2b   : > { %575 = vperm.xlu0 %1279, %v557_v28  }
  0x2c   : > { %580 = vperm.xlu1 %1280, %v558_v29  }
  0x2d   : > { %1231 = vmatmul.mubr.bf16.vlgmr.msra.gmra.mxu0 %v1290_v18 }
  0x2e   : > { %1234 = vmatprep.mubr.bf16.mxu0 %v1291_v21 }
  0x2f   : > { %792 = vperm.xlu0 %1279, %v782_v31  }
  0x30   : > { %797 = vperm.xlu1 %1280, %v783_v32  }
  0x33   : > { %802 = vperm.xlu0 %1279, %v784_v34  }
  0x34   : > { %807 = vperm.xlu1 %1280, %v785_v35  }
  0x35   : > { %1235 = vmatmul.mubr.bf16.gmra.mxu0 %v1292_v24 }
  0x36   : > { %1238 = vmatprep.mubr.bf16.mxu0 %v1293_v27 }
  0x37   : > { %812 = vperm.xlu0 %1279, %v786_v37   ;;  %v680_v37 = vld [vmem:[%s1483_s18 + $0x6] sm:$0x3] }
  0x38   : > { %817 = vperm.xlu1 %1280, %v787_v38   ;;  %v688_v43 = vunpack.c.l.s8.bf16 %v680_v37 }
  0x3b   : > { %822 = vperm.xlu0 %1279, %v788_v39   ;;  %v681_v39 = vld [vmem:[%s1483_s18 + $0x8] sm:$0x3] }
  0x3c   : > { %827 = vperm.xlu1 %1280, %v789_v40   ;;  %v682_v40 = vld [vmem:[%s1483_s18 + $0xa] sm:$0x3]  ;;  %v689_v44 = vunpack.c.l.s8.bf16 %v681_v39 }
  0x3d   : > { %1239 = vmatmul.mubr.bf16.gmra.mxu0 %v1294_v30  ;;  %v690_v45 = vunpack.c.l.s8.bf16 %v682_v40 }
  0x3e   : > { %1242 = vmatprep.mubr.bf16.mxu0 %v1295_v33 }
  0x45   : > { %1243 = vmatmul.mubr.bf16.gmra.mxu0 %v1296_v36  ;;  %v679_v36 = vld [vmem:[%s1483_s18 + $0x4] sm:$0x3] }
  0x46   : > { %v687_v42 = vunpack.c.l.s8.bf16 %v679_v36 }
  0x8a   : > { %v646_v52 = vpop.permute.xlu0 %645 }
  0x8b   : > { %v636_v50 = vpop.permute.xlu1 %635 }
  0x8e   : > { %v651_v57 = vpop.permute.xlu0 %650 }
  0x8f   : > { %v641_v55 = vpop.permute.xlu1 %640 }
  0x92   : > { %v626_v62 = vpop.permute.xlu0 %625 }
  0x93   : > { %v631_v60 = vpop.permute.xlu1 %630 }
  0x96   : > { %v616_v3 = vpop.permute.xlu0 %615 }
  0x97   : > { %v621_v1 = vpop.permute.xlu1 %620 }
  0x9a   : > { %v606_v14 = vpop.permute.xlu0 %605 }
  0x9b   : > { %v611_v11 = vpop.permute.xlu1 %610 }
  0x9e   : > { %v596_v20 = vpop.permute.xlu0 %595 }
  0x9f   : > { %v601_v18 = vpop.permute.xlu1 %600 }
  0xa2   : > { %v586_v27 = vpop.permute.xlu0 %585 }
  0xa3   : > { %v591_v24 = vpop.permute.xlu1 %590 }
  0xa6   : > { %v576_v33 = vpop.permute.xlu0 %575 }
  0xa7   : > { %v581_v31 = vpop.permute.xlu1 %580 }
  0xed   : > { %v1232_v46 = vpop.f32.mrf.mxu0 }
  0xee   : > { %v655_v32 = vmul.f32 %v1232_v46, %v586_v27  ;;  %v1139_v46 = vcombine.low %v687_v42, %v688_v43 }
  0xef   : > { %v1487_v47 = vpop.f32.mrf.mxu0 }
  0xf0   : > { %v653_v38 = vmul.f32 %v576_v33, %v1487_v47 }
  0xf1   : > { %v1233_v48 = vpop.f32.mrf.mxu0 }
  0xf2   : > { %v656_v29 = vmul.f32 %v1233_v48, %v591_v24  ;;  %v1140_v48 = vcombine.low %v689_v44, %v690_v45 }
  0xf3   : > { %v497_v49 = vpop.f32.mrf.mxu0 }
  0xf4   : > { %v670_v34 = vpack.c.bf16 %v656_v29, %v655_v32  ;;  %v654_v35 = vmul.f32 %v581_v31, %v497_v49  ;;  %v683_v49 = vld [vmem:[%s1483_s18 + $0xc] sm:$0x3] }
  0xf5   : > { %v1236_v51 = vpop.f32.mrf.mxu0 }
  0xf6   : > { %v659_v23 = vmul.f32 %v1236_v51, %v606_v14  ;;  %v669_v41 = vpack.c.bf16 %v654_v35, %v653_v38  ;;  %v691_v51 = vunpack.c.l.s8.bf16 %v683_v49 }
  0xf7   : > { %v510_v53 = vpop.f32.mrf.mxu0 }
  0xf8   : > { %v657_v28 = vmul.f32 %v596_v20, %v510_v53  ;;  %v793_v53 = vpop.permute.xlu0 %792 }
  0xf9   : > { %v1237_v54 = vpop.f32.mrf.mxu0 }
  0xfa   : > { %v660_v21 = vmul.f32 %v1237_v54, %v611_v11  ;;  %v798_v54 = vpop.permute.xlu1 %797 }
  0xfb   : > { %v513_v56 = vpop.f32.mrf.mxu0 }
  0xfc   : > { %v672_v25 = vpack.c.bf16 %v660_v21, %v659_v23  ;;  %v658_v26 = vmul.f32 %v601_v18, %v513_v56 }
  0xfd   : > { %v1240_v58 = vpop.f32.mrf.mxu0 }
  0xfe   : > { %v663_v15 = vmul.f32 %v1240_v58, %v626_v62  ;;  %v671_v30 = vpack.c.bf16 %v658_v26, %v657_v28 }
  0xff   : > { %v526_v59 = vpop.f32.mrf.mxu0 }
 0x100   : > { %v661_v19 = vmul.f32 %v616_v3, %v526_v59 }
 0x101   : > { %v1241_v61 = vpop.f32.mrf.mxu0 }
 0x102   : > { %v664_v12 = vmul.f32 %v1241_v61, %v631_v60 }
 0x103   : > { %v529_v63 = vpop.f32.mrf.mxu0 }
 0x104   : > { %v674_v16 = vpack.c.bf16 %v664_v12, %v663_v15  ;;  %v662_v17 = vmul.f32 %v621_v1, %v529_v63  ;;  %v808_v63 = vpop.permute.xlu1 %807 }
 0x105   : > { %v1244_v0 = vpop.f32.mrf.mxu0 }
 0x106   : > { %v667_v5 = vmul.f32 %v1244_v0, %v646_v52  ;;  %v673_v22 = vpack.c.bf16 %v662_v17, %v661_v19 }
 0x107   : > { %v542_v2 = vpop.f32.mrf.mxu0 }
 0x108   : > { %v665_v8 = vmul.f32 %v636_v50, %v542_v2  ;;  %v684_v50 = vld [vmem:[%s1483_s18 + $0xe] sm:$0x3] }
 0x109   : > { %v1245_v4 = vpop.f32.mrf.mxu0  ;;  %v692_v52 = vunpack.c.l.s8.bf16 %v684_v50 }
 0x10a   : > { %v668_v6 = vmul.f32 %v1245_v4, %v651_v57  ;;  %v1142_v57 = vld [vmem:[%s1611_s5] ss:$0 sm:$0xff] }
 0x10b   : > { %v545_v7 = vpop.f32.mrf.mxu0  ;;  %v1141_v47 = vcombine.low %v691_v51, %v692_v52 }
 0x10c   : > { %v666_v9 = vmul.f32 %v641_v55, %v545_v7  ;;  %v676_v10 = vpack.c.bf16 %v668_v6, %v667_v5  ;;  %v803_v55 = vpop.permute.xlu0 %802 }
 0x10e   : > { %v675_v13 = vpack.c.bf16 %v666_v9, %v665_v8  ;;  %1246 = vmatprep.subr.bf16.mxu1 %v676_v10  ;;  %v818_v8 = vpop.permute.xlu1 %817 }
 0x10f   : > { %1247 = vmatpush3.bf16.msra.mxu1 %v676_v10 }
 0x110   : > { %1248 = vmatprep.subr.bf16.mxu1 %v675_v13  ;;  %v813_v2 = vpop.permute.xlu0 %812 }
 0x112   : > { %v828_v18 = vpop.permute.xlu1 %827 }
 0x113   : > { %1249 = vmatpush3.bf16.msra.mxu1 %v675_v13 }
 0x114   : > { %1250 = vmatprep.subr.bf16.mxu1 %v674_v16  ;;  %v823_v10 = vpop.permute.xlu0 %822 }
 0x117   : > { %1251 = vmatpush3.bf16.msra.mxu1 %v674_v16 }
 0x118   : > { %1252 = vmatprep.subr.bf16.mxu1 %v673_v22 }
 0x11b   : > { %1253 = vmatpush3.bf16.msra.mxu1 %v673_v22 }
 0x11c   : > { %1254 = vmatprep.subr.bf16.mxu1 %v672_v25 }
 0x11f   : > { %1255 = vmatpush3.bf16.msra.mxu1 %v672_v25 }
 0x120   : > { %1256 = vmatprep.subr.bf16.mxu1 %v671_v30 }
 0x123   : > { %1257 = vmatpush3.bf16.msra.mxu1 %v671_v30 }
 0x124   : > { %1258 = vmatprep.subr.bf16.mxu1 %v670_v34 }
 0x127   : > { %1259 = vmatpush3.bf16.msra.mxu1 %v670_v34 }
 0x128   : > { %1260 = vmatprep.subr.bf16.mxu1 %v669_v41 }
 0x12b   : > { %1261 = vmatpush3.bf16.msra.mxu1 %v669_v41 }
 0x12e   : > { %1263 = vmatmul.mubr.bf16.vlgmr.msra.gmra.mxu1 %v1139_v46 }
 0x12f   : > { %1266 = vmatprep.mubr.bf16.mxu1 %v1140_v48 }
 0x136   : > { %1267 = vmatmul.mubr.bf16.gmra.mxu1 %v1141_v47 }
 0x1ee   : > { %v1264_v56 = vpop.f32.mrf.mxu1 }
 0x1ef   : > { %v832_v58 = vmul.f32 %v1264_v56, %v803_v55 }
 0x1f0   : > { %v751_v59 = vpop.f32.mrf.mxu1 }
 0x1f1   : > { %v1499_v60 = vadd.f32 %v1142_v57, %v832_v58  ;;  %v830_v61 = vmul.f32 %v793_v53, %v751_v59 }
 0x1f2   : > { %v1265_v62 = vpop.f32.mrf.mxu1 }
 0x1f3   : > { %v1501_v0 = vadd.f32 %v1142_v57, %v830_v61  ;;  %859 = vadd.xlane.f32.xlu0 %v1499_v60  ;;  %v881_v1 = vmul.f32 %v1499_v60, %v1499_v60  ;;  %v833_v4 = vmul.f32 %v1265_v62, %v808_v63 }
 0x1f4   : > { %v754_v3 = vpop.f32.mrf.mxu1 }
 0x1f5   : > { %891 = vadd.xlane.f32.xlu1 %v881_v1  ;;  %v831_v6 = vmul.f32 %v798_v54, %v754_v3  ;;  %v879_v7 = vmul.f32 %v1501_v0, %v1501_v0  ;;  %v1509_v9 = vadd.f32 %v1142_v57, %v833_v4 }
 0x1f6   : > { %v1268_v5 = vpop.f32.mrf.mxu1 }
 0x1f7   : > { %855 = vadd.xlane.f32.xlu0 %v1501_v0  ;;  %v1511_v12 = vadd.f32 %v1142_v57, %v831_v6  ;;  %v836_v13 = vmul.f32 %v1268_v5, %v823_v10  ;;  %v882_v14 = vmul.f32 %v1509_v9, %v1509_v9 }
 0x1f8   : > { %v767_v11 = vpop.f32.mrf.mxu1 }
 0x1f9   : > { %887 = vadd.xlane.f32.xlu1 %v879_v7  ;;  %v1517_v16 = vadd.f32 %v1142_v57, %v836_v13  ;;  %v834_v17 = vmul.f32 %v813_v2, %v767_v11  ;;  %v880_v20 = vmul.f32 %v1511_v12, %v1511_v12 }
 0x1fa   : > { %v1269_v15 = vpop.f32.mrf.mxu1 }
 0x1fb   : > { %861 = vadd.xlane.f32.xlu0 %v1509_v9  ;;  %v837_v19 = vmul.f32 %v1269_v15, %v828_v18  ;;  %v1522_v22 = vadd.f32 %v1142_v57, %v834_v17  ;;  %v885_v27 = vmul.f32 %v1517_v16, %v1517_v16 }
 0x1fc   : > { %v770_v21 = vpop.f32.mrf.mxu1 }
 0x1fd   : > { %857 = vadd.xlane.f32.xlu1 %v1511_v12  ;;  %v1524_v23 = vadd.f32 %v1142_v57, %v837_v19  ;;  %v835_v24 = vmul.f32 %v818_v8, %v770_v21  ;;  %v883_v25 = vmul.f32 %v1522_v22, %v1522_v22 }
 0x1ff   : > { %893 = vadd.xlane.f32.xlu0 %v882_v14  ;;  %v1530_v26 = vadd.f32 %v1142_v57, %v835_v24  ;;  %v886_v29 = vmul.f32 %v1524_v23, %v1524_v23  ;;  %v1561_v24 = vld [vmem:[%s1612_s6] ss:$0 sm:$0xff] }
 0x201   : > { %867 = vadd.xlane.f32.xlu1 %v1517_v16  ;;  %v884_v28 = vmul.f32 %v1530_v26, %v1530_v26 }
 0x203   : > { %889 = vadd.xlane.f32.xlu0 %v880_v20 }
 0x205   : > { %863 = vadd.xlane.f32.xlu1 %v1522_v22 }
 0x207   : > { %869 = vadd.xlane.f32.xlu0 %v1524_v23 }
 0x209   : > { %895 = vadd.xlane.f32.xlu1 %v883_v25 }
 0x20b   : > { %865 = vadd.xlane.f32.xlu0 %v1530_v26 }
 0x20d   : > { %899 = vadd.xlane.f32.xlu1 %v885_v27 }
 0x20f   : > { %897 = vadd.xlane.f32.xlu0 %v884_v28 }
 0x213   : > { %901 = vadd.xlane.f32.xlu0 %v886_v29 }
 0x27c   : > { %v860_v30 = vpop.xlane.xlu0 %859 }
 0x27d   : > { %v873_v31 = vmul.f32 0.03125, %v860_v30 }
 0x27e   : > { %v892_v32 = vpop.xlane.xlu1 %891 }
 0x27f   : > { %v913_v33 = vmul.f32 %v873_v31, %v873_v31  ;;  %v905_v34 = vmul.f32 0.03125, %v892_v32  ;;  %v937_v14 = vsub.f32 %v1499_v60, %v873_v31 }
 0x280   : > { %v856_v35 = vpop.xlane.xlu0 %855 }
 0x281   : > { %v921_v36 = vsub.f32 %v905_v34, %v913_v33  ;;  %v1539_v37 = vmul.f32 0.03125, %v856_v35 }
 0x282   : > { %v888_v38 = vpop.xlane.xlu1 %887 }
 0x283   : > { %v929_v39 = vmax.f32 %v921_v36, 0.0  ;;  %v911_v40 = vmul.f32 %v1539_v37, %v1539_v37  ;;  %v903_v41 = vmul.f32 0.03125, %v888_v38  ;;  %v935_v31 = vsub.f32 %v1501_v0, %v1539_v37  ;;  %v1144_v38 = vld [vmem:[%s1613_s7] ss:$0 sm:$0xff] }
 0x284   : > { %v862_v42 = vpop.xlane.xlu0 %861 }
 0x285   : > { %v945_v43 = vadd.f32 1e-05, %v929_v39  ;;  %v919_v44 = vsub.f32 %v903_v41, %v911_v40  ;;  %v874_v45 = vmul.f32 0.03125, %v862_v42 }
 0x286   : > { %v858_v46 = vpop.xlane.xlu1 %857 }
 0x287   : > { %v927_v48 = vmax.f32 %v919_v44, 0.0  ;;  %1297 = vrsqrt.f32 %v945_v43  ;;  %v914_v51 = vmul.f32 %v874_v45, %v874_v45  ;;  %v1543_v52 = vmul.f32 0.03125, %v858_v46 }
 0x288   : > { %v894_v49 = vpop.xlane.xlu0 %893  ;;  %v938_v34 = vsub.f32 %v1509_v9, %v874_v45 }
 0x289   : > { %v943_v50 = vadd.f32 1e-05, %v927_v48  ;;  %v906_v47 = vmul.f32 0.03125, %v894_v49  ;;  %v912_v56 = vmul.f32 %v1543_v52, %v1543_v52  ;;  %v936_v9 = vsub.f32 %v1511_v12, %v1543_v52 }
 0x28a   : > { %v868_v53 = vpop.xlane.xlu1 %867 }
 0x28b   : > { %v922_v54 = vsub.f32 %v906_v47, %v914_v51  ;;  %1299 = vrsqrt.f32 %v943_v50  ;;  %v1551_v7 = vmul.f32 0.03125, %v868_v53 }
 0x28c   : > { %v890_v55 = vpop.xlane.xlu0 %889 }
 0x28d   : > { %v930_v57 = vmax.f32 %v922_v54, 0.0  ;;  %v904_v58 = vmul.f32 0.03125, %v890_v55  ;;  %v917_v19 = vmul.f32 %v1551_v7, %v1551_v7 }
 0x28e   : > { %v864_v59 = vpop.xlane.xlu1 %863 }
 0x28f   : > { %v946_v61 = vadd.f32 1e-05, %v930_v57  ;;  %v920_v62 = vsub.f32 %v904_v58, %v912_v56  ;;  %v1547_v63 = vmul.f32 0.03125, %v864_v59 }
 0x290   : > { %v870_v1 = vpop.xlane.xlu0 %869 }
 0x291   : > { %1301 = vrsqrt.f32 %v946_v61  ;;  %v928_v2 = vmax.f32 %v920_v62, 0.0  ;;  %v915_v5 = vmul.f32 %v1547_v63, %v1547_v63  ;;  %v1563_v25 = vmul.f32 0.03125, %v870_v1 }
 0x292   : > { %v896_v3 = vpop.xlane.xlu1 %895  ;;  %v939_v59 = vsub.f32 %v1522_v22, %v1547_v63 }
 0x293   : > { %v944_v4 = vadd.f32 1e-05, %v928_v2  ;;  %v907_v6 = vmul.f32 0.03125, %v896_v3  ;;  %v918_v40 = vmul.f32 %v1563_v25, %v1563_v25  ;;  %v942_v63 = vsub.f32 %v1524_v23, %v1563_v25 }
 0x294   : > { %v866_v8 = vpop.xlane.xlu0 %865  ;;  %v1298_v10 = vpop.eup %1297 }
 0x295   : > { %1303 = vrsqrt.f32 %v944_v4  ;;  %v923_v11 = vsub.f32 %v907_v6, %v915_v5  ;;  %v1553_v13 = vmul.f32 0.03125, %v866_v8  ;;  %v961_v18 = vmul.f32 %v1298_v10, %v937_v14 }
 0x296   : > { %v900_v15 = vpop.xlane.xlu1 %899  ;;  %v941_v4 = vsub.f32 %v1517_v16, %v1551_v7 }
 0x297   : > { %v931_v17 = vmax.f32 %v923_v11, 0.0  ;;  %v909_v20 = vmul.f32 0.03125, %v900_v15  ;;  %v916_v28 = vmul.f32 %v1553_v13, %v1553_v13  ;;  %v975_v33 = vmul.f32 %v1561_v24, %v961_v18 }
 0x298   : > { %v898_v21 = vpop.xlane.xlu0 %897  ;;  %v1300_v29 = vpop.eup %1299  ;;  %v940_v8 = vsub.f32 %v1530_v26, %v1553_v13 }
 0x299   : > { %v947_v27 = vadd.f32 1e-05, %v931_v17  ;;  %v908_v60 = vmul.f32 0.03125, %v898_v21  ;;  %v925_v30 = vsub.f32 %v909_v20, %v917_v19  ;;  %v959_v39 = vmul.f32 %v1300_v29, %v935_v31 }
 0x29a   : > { %v989_v48 = vadd.f32 %v1144_v38, %v975_v33 }
 0x29b   : > { %1305 = vrsqrt.f32 %v947_v27  ;;  %v924_v32 = vsub.f32 %v908_v60, %v916_v28  ;;  %v933_v35 = vmax.f32 %v925_v30, 0.0  ;;  %v973_v45 = vmul.f32 %v1561_v24, %v959_v39 }
 0x29c   : > { %v902_v36 = vpop.xlane.xlu0 %901  ;;  %v997_v55 = vmax.f32 %v989_v48, 0.0 }
 0x29d   : > { %v932_v41 = vmax.f32 %v924_v32, 0.0  ;;  %v910_v42 = vmul.f32 0.03125, %v902_v36  ;;  %v949_v37 = vadd.f32 1e-05, %v933_v35  ;;  %v987_v56 = vadd.f32 %v1144_v38, %v973_v45 }
 0x29e   : > { %v1302_v0 = vpop.eup %1301 }
 0x29f   : > { %v962_v43 = vmul.f32 %v1302_v0, %v938_v34  ;;  %v948_v44 = vadd.f32 1e-05, %v932_v41  ;;  %v926_v46 = vsub.f32 %v910_v42, %v918_v40  ;;  %1307 = vrsqrt.f32 %v949_v37 }
 0x2a0   : > { %v995_v62 = vmax.f32 %v987_v56, 0.0 }
 0x2a1   : > { %v976_v49 = vmul.f32 %v1561_v24, %v962_v43  ;;  %1309 = vrsqrt.f32 %v948_v44  ;;  %v934_v50 = vmax.f32 %v926_v46, 0.0 }
 0x2a2   : > { %v1304_v51 = vpop.eup %1303 }
 0x2a3   : > { %v990_v47 = vadd.f32 %v1144_v38, %v976_v49  ;;  %v960_v53 = vmul.f32 %v1304_v51, %v936_v9  ;;  %v950_v54 = vadd.f32 1e-05, %v934_v50 }
 0x2a5   : > { %v998_v57 = vmax.f32 %v990_v47, 0.0  ;;  %v974_v58 = vmul.f32 %v1561_v24, %v960_v53  ;;  %1311 = vrsqrt.f32 %v950_v54 }
 0x2a7   : > { %v1171_v12 = vpack.c.bf16 %v998_v57, %v997_v55  ;;  %v988_v52 = vadd.f32 %v1144_v38, %v974_v58 }
 0x2a8   : > { %v1306_v61 = vpop.eup %1305 }
 0x2a9   : > { %1183 = vst [vmem:[%s1585_s9 + $0x8] sm:$0xff] %v1171_v12   ;;  %v996_v1 = vmax.f32 %v988_v52, 0.0  ;;  %v963_v2 = vmul.f32 %v1306_v61, %v939_v59 }
 0x2ab   : > { %v1166_v3 = vpack.c.bf16 %v996_v1, %v995_v62  ;;  %v977_v6 = vmul.f32 %v1561_v24, %v963_v2 }
 0x2ac   : > { %v1308_v5 = vpop.eup %1307 }
 0x2ad   : > { %1167 = vst [vmem:[%s1585_s9] sm:$0xff] %v1166_v3   ;;  %v965_v11 = vmul.f32 %v1308_v5, %v941_v4  ;;  %v991_v14 = vadd.f32 %v1144_v38, %v977_v6 }
 0x2ae   : > { %v1310_v10 = vpop.eup %1309 }
 0x2af   : > { %v964_v22 = vmul.f32 %v1310_v10, %v940_v8  ;;  %v979_v15 = vmul.f32 %v1561_v24, %v965_v11  ;;  %v999_v19 = vmax.f32 %v991_v14, 0.0 }
 0x2b1   : > { %v978_v16 = vmul.f32 %v1561_v24, %v964_v22  ;;  %v993_v20 = vadd.f32 %v1144_v38, %v979_v15 }
 0x2b2   : > { %v1312_v7 = vpop.eup %1311 }
 0x2b3   : > { %v992_v17 = vadd.f32 %v1144_v38, %v978_v16  ;;  %v966_v18 = vmul.f32 %v1312_v7, %v942_v63  ;;  %v1001_v28 = vmax.f32 %v993_v20, 0.0 }
 0x2b5   : > { %v1000_v21 = vmax.f32 %v992_v17, 0.0  ;;  %v980_v26 = vmul.f32 %v1561_v24, %v966_v18 }
 0x2b7   : > { %v1176_v13 = vpack.c.bf16 %v1000_v21, %v999_v19  ;;  %v994_v27 = vadd.f32 %v1144_v38, %v980_v26 }
 0x2b9   : > { %1184 = vst [vmem:[%s1585_s9 + $0x10] sm:$0xff] %v1176_v13   ;;  %v1002_v60 = vmax.f32 %v994_v27, 0.0 }
 0x2bb   : > { %v1181_v23 = vpack.c.bf16 %v1002_v60, %v1001_v28 }
 0x2bd   : > { %1185 = vst [vmem:[%s1585_s9 + $0x18] sm:$0xff] %v1181_v23  }
 0x2be PF: > { %s18_s27 = sadd.s32 1, %s1319_s27  }
 0x2bf   : > { %p15_p4 = scmp.ge.s32.totalorder %s18_s27, 4  }
 0x2c1   :  { %17 = sbr.rel (!%p15_p4) target bundleno = 1 (0x1), region = 85 }

</bundles_post_ra>
